<compile_context>
chip_gen: v6e
topology: v6e:2x2x1
jax: 0.10.0
libtpu: 0.0.40
codegen_flags: <defaults>
</compile_context>

<pallas_src>
import functools
import math

import numpy as np
import jax
import jax.numpy as jnp
from jax import lax
from jax.experimental import pallas as pl
from jax.experimental.pallas import tpu as pltpu


def _plan_dir_kernel(ego_ref, lanes_ref, out_ref, *, dis_thresh):
    """One batch element per grid step.

    ego_ref   : [1, 2, T]    rows = (ex, ey) per-step ego deltas
    lanes_ref : [1, 3, VP]   rows = (lane_x, lane_y, end_of_polyline indicator)
                             lane coords already denormalised + 1e6 masked
    out_ref   : [1, 5, T]    rows = (tdx, tdy, ldx, ldy, zero_mask)
    """
    f32 = jnp.float32

    ex = ego_ref[:, 0, :]                       # [1, T]
    ey = ego_ref[:, 1, :]
    lx = lanes_ref[:, 0, :]                     # [1, VP]
    ly = lanes_ref[:, 1, :]
    end_pat = lanes_ref[:, 2, :]                # [1, VP] 1.0 where p == P-1

    T = ex.shape[-1]
    VP = lx.shape[-1]

    # --- cumulative trajectory: px/py = cumsum(e) via lower-triangular mask ---
    ti = lax.broadcasted_iota(jnp.int32, (T, T), 0)
    tj = lax.broadcasted_iota(jnp.int32, (T, T), 1)
    tri = jnp.where(tj <= ti, f32(1.0), f32(0.0))               # [T, T]
    px = jnp.sum(tri[None] * ex[:, None, :], axis=-1)           # [1, T]
    py = jnp.sum(tri[None] * ey[:, None, :], axis=-1)

    # --- static mask: ||pred[-1] - pred[0]|| < 1.0 ---
    sdx = px[:, T - 1:T] - px[:, 0:1]                           # [1, 1]
    sdy = py[:, T - 1:T] - py[:, 0:1]
    static_mask = (sdx * sdx + sdy * sdy) < f32(1.0)            # [1, 1]

    # --- fused squared distances ego(t) -> every lane point, lane-dense axis ---
    dx = px[:, :, None] - lx[:, None, :]                        # [1, T, VP]
    dy = py[:, :, None] - ly[:, None, :]
    d2 = dx * dx + dy * dy                                      # stays in vregs

    # --- single flattened first-occurrence argmin over V*P
    #     (row-major == closest point on the closest instance, same tie-break) ---
    dmin = jnp.min(d2, axis=-1, keepdims=True)                  # [1, T, 1]
    fiota = lax.broadcasted_iota(jnp.int32, d2.shape, 2)
    flat_idx = jnp.min(jnp.where(d2 == dmin, fiota, jnp.int32(VP)),
                       axis=-1)                                 # [1, T]

    oh = jnp.where(fiota == flat_idx[:, :, None], f32(1.0), f32(0.0))
    min_x = jnp.sum(oh * lx[:, None, :], axis=-1)               # [1, T]
    min_y = jnp.sum(oh * ly[:, None, :], axis=-1)
    is_end = jnp.sum(oh * end_pat[:, None, :], axis=-1) > f32(0.5)

    # next point on the same polyline: p+1, or p-1 when p == P-1
    next_idx = jnp.where(is_end, flat_idx - 1, flat_idx + 1)    # [1, T]
    oh_n = jnp.where(fiota == next_idx[:, :, None], f32(1.0), f32(0.0))
    nxt_x = jnp.sum(oh_n * lx[:, None, :], axis=-1)
    nxt_y = jnp.sum(oh_n * ly[:, None, :], axis=-1)

    # --- distance mask: ||closest_pt - pred|| > dis_thresh ---
    ddx = min_x - px
    ddy = min_y - py
    dist_mask = (ddx * ddx + ddy * ddy) > f32(dis_thresh * dis_thresh)

    # --- trajectory direction: diff(cumsum(e)) == e shifted by one,
    #     last element repeated  (tiny [T,T] select matrix, no [B,T,T] M) ---
    S = jnp.where(tj == jnp.minimum(ti + 1, T - 1), f32(1.0), f32(0.0))
    tdx = jnp.sum(S[None] * ex[:, None, :], axis=-1)            # [1, T]
    tdy = jnp.sum(S[None] * ey[:, None, :], axis=-1)

    # --- lane segment direction ---
    ldx = nxt_x - min_x
    ldy = nxt_y - min_y

    zmask = jnp.where(jnp.logical_or(dist_mask, static_mask), f32(1.0), f32(0.0))

    out_ref[:, 0, :] = tdx
    out_ref[:, 1, :] = tdy
    out_ref[:, 2, :] = ldx
    out_ref[:, 3, :] = ldy
    out_ref[:, 4, :] = zmask


def plan_map_direction_loss(ego_fut_preds, lane_preds, lane_score_preds,
                            weight=None, avg_factor=None, reduction='mean',
                            loss_weight=1.0, map_thresh=0.5, dis_thresh=2.0,
                            lane_div_cls_idx=0,
                            pc_range=(-15.0, -30.0, -2.0, 15.0, 30.0, 2.0)):
    """JAX/Pallas equivalent of PlanMapDirectionLoss.forward.

    ego_fut_preds:    [B, fut_ts, 2]
    lane_preds:       [B, num_vec, num_pts, 2]  (normalized to [0, 1])
    lane_score_preds: [B, num_vec, 3]
    """
    f32 = jnp.float32
    ego = ego_fut_preds.astype(f32)
    lanes = lane_preds.astype(f32)
    scores = lane_score_preds.astype(f32)

    B, T, _ = ego.shape
    _, V, P, _ = lanes.shape
    VP = V * P

    # ---- layout plumbing (fuses into the packing ops that must exist anyway) ----
    ego_xy = jnp.stack([ego[..., 0], ego[..., 1]], axis=1)               # [B, 2, T]

    # lane denorm + invalid-lane 1e6 sentinel (mirrors the torch preprocessing)
    lx = lanes[..., 0] * (pc_range[3] - pc_range[0]) + pc_range[0]
    ly = lanes[..., 1] * (pc_range[4] - pc_range[1]) + pc_range[1]
    not_div = scores[..., lane_div_cls_idx] < map_thresh                 # [B, V]
    lx = jnp.where(not_div[:, :, None], f32(1e6), lx)
    ly = jnp.where(not_div[:, :, None], f32(1e6), ly)
    lx = lx.reshape(B, VP)
    ly = ly.reshape(B, VP)
    # static "last point of its polyline" indicator (baked constant pattern)
    end_pat = (np.arange(VP) % P == P - 1).astype(np.float32)            # [VP]
    end_row = jnp.broadcast_to(jnp.asarray(end_pat), (B, VP))
    lanes_pk = jnp.stack([lx, ly, end_row], axis=1)                      # [B, 3, VP]

    kernel = functools.partial(_plan_dir_kernel, dis_thresh=float(dis_thresh))

    packed = pl.pallas_call(
        kernel,
        out_shape=jax.ShapeDtypeStruct((B, 5, T), jnp.float32),
        grid=(B,),
        in_specs=[pl.BlockSpec((1, 2, T), lambda b: (b, 0, 0)),
                  pl.BlockSpec((1, 3, VP), lambda b: (b, 0, 0))],
        out_specs=pl.BlockSpec((1, 5, T), lambda b: (b, 0, 0)),
        compiler_params=pltpu.CompilerParams(
            dimension_semantics=("parallel",)),
    )(ego_xy, lanes_pk)

    tdx = packed[:, 0, :]
    tdy = packed[:, 1, :]
    ldx = packed[:, 2, :]
    ldy = packed[:, 3, :]
    zmask = packed[:, 4, :]

    # TODO(synk): atan2 + sequential pi-wrapping kept in JAX glue (atan2 is not
    # guaranteed to lower in Mosaic, and atan2(cross,dot) wraps differently from
    # the reference's sequential pi-subtraction branches).
    traj_yaw = jnp.arctan2(tdy, tdx)
    lane_yaw = jnp.arctan2(ldy, ldx)
    d = traj_yaw - lane_yaw
    pi = math.pi
    d = jnp.where(d > pi, d - pi, d)
    d = jnp.where(d > pi / 2.0, d - pi, d)
    d = jnp.where(d < -pi, d + pi, d)
    d = jnp.where(d < -pi / 2.0, d + pi, d)
    d = jnp.where(zmask > 0.5, jnp.float32(0.0), d)
    loss = jnp.abs(d)                                            # [B, T]

    # mmdet weighted_loss semantics
    if weight is not None:
        loss = loss * weight
    if avg_factor is None:
        if reduction == 'mean':
            loss = jnp.mean(loss)
        elif reduction == 'sum':
            loss = jnp.sum(loss)
    else:
        if reduction == 'mean':
            loss = jnp.sum(loss) / avg_factor
        elif reduction != 'none':
            raise ValueError('avg_factor can not be used with reduction="sum"')
    return loss_weight * loss


if __name__ == "__main__":
    # PlanMapDirectionLoss has no learnable parameters; only config scalars.
    key = jax.random.PRNGKey(0)
    k1, k2, k3 = jax.random.split(key, 3)

    B, T, V, P = 2, 6, 16, 20
    ego_fut_preds = jax.random.normal(k1, (B, T, 2), dtype=jnp.float32) * 2.0
    lane_preds = jax.random.uniform(k2, (B, V, P, 2), dtype=jnp.float32)
    lane_score_preds = jax.random.uniform(k3, (B, V, 3), dtype=jnp.float32)

    loss_fn = jax.jit(plan_map_direction_loss)
    loss = loss_fn(ego_fut_preds, lane_preds, lane_score_preds)
    loss = jax.block_until_ready(loss)
    assert jnp.isfinite(loss), loss
    print("KERNEL_OK")
</pallas_src>

<mosaic_0001>
module attributes {stable_mosaic.version = 11 : i64} {
  func.func @_plan_dir_kernel(%arg0: i32, %arg1: memref<1x2x6xf32, #tpu.memory_space<vmem>>, %arg2: memref<1x3x320xf32, #tpu.memory_space<vmem>>, %arg3: memref<1x5x6xf32, #tpu.memory_space<vmem>>) attributes {dimension_semantics = [#tpu.dimension_semantics<parallel>], iteration_bounds = array<i64: 2>, scalar_prefetch = 0 : i64, scratch_operands = 0 : i64, tpu.core_type = #tpu.core_type<tc>, window_params = [{transform_indices = @transform_0, window_bounds = array<i64: 1, 2, 6>}, {transform_indices = @transform_1, window_bounds = array<i64: 1, 3, 320>}, {transform_indices = @transform_2, window_bounds = array<i64: 1, 5, 6>}]} {
    %c0 = arith.constant 0 : index
    %c0_0 = arith.constant 0 : index
    %c0_1 = arith.constant 0 : index
    %0 = vector.load %arg1[%c0, %c0_0, %c0_1] : memref<1x2x6xf32, #tpu.memory_space<vmem>>, vector<1x1x6xf32>
    %1 = vector.shape_cast %0 : vector<1x1x6xf32> to vector<1x6xf32>
    %c0_2 = arith.constant 0 : index
    %c1 = arith.constant 1 : index
    %c0_3 = arith.constant 0 : index
    %2 = vector.load %arg1[%c0_2, %c1, %c0_3] : memref<1x2x6xf32, #tpu.memory_space<vmem>>, vector<1x1x6xf32>
    %3 = vector.shape_cast %2 : vector<1x1x6xf32> to vector<1x6xf32>
    %c0_4 = arith.constant 0 : index
    %c0_5 = arith.constant 0 : index
    %c0_6 = arith.constant 0 : index
    %4 = vector.load %arg2[%c0_4, %c0_5, %c0_6] : memref<1x3x320xf32, #tpu.memory_space<vmem>>, vector<1x1x320xf32>
    %5 = vector.shape_cast %4 : vector<1x1x320xf32> to vector<1x320xf32>
    %c0_7 = arith.constant 0 : index
    %c1_8 = arith.constant 1 : index
    %c0_9 = arith.constant 0 : index
    %6 = vector.load %arg2[%c0_7, %c1_8, %c0_9] : memref<1x3x320xf32, #tpu.memory_space<vmem>>, vector<1x1x320xf32>
    %7 = vector.shape_cast %6 : vector<1x1x320xf32> to vector<1x320xf32>
    %c0_10 = arith.constant 0 : index
    %c2 = arith.constant 2 : index
    %c0_11 = arith.constant 0 : index
    %8 = vector.load %arg2[%c0_10, %c2, %c0_11] : memref<1x3x320xf32, #tpu.memory_space<vmem>>, vector<1x1x320xf32>
    %9 = vector.shape_cast %8 : vector<1x1x320xf32> to vector<1x320xf32>
    %10 = tpu.iota {dimensions = array<i32: 0>} : vector<6x6xi32>
    %11 = tpu.iota {dimensions = array<i32: 1>} : vector<6x6xi32>
    %12 = arith.cmpi sle, %11, %10 : vector<6x6xi32>
    %cst = arith.constant 1.000000e+00 : f32
    %cst_12 = arith.constant 0.000000e+00 : f32
    %13 = vector.broadcast %cst : f32 to vector<6x6xf32>
    %14 = vector.broadcast %cst_12 : f32 to vector<6x6xf32>
    %15 = arith.select %12, %13, %14 : vector<6x6xi1>, vector<6x6xf32>
    %16 = vector.shape_cast %15 : vector<6x6xf32> to vector<1x6x6xf32>
    %17 = vector.shape_cast %1 : vector<1x6xf32> to vector<1x1x6xf32>
    %18 = vector.broadcast %17 : vector<1x1x6xf32> to vector<1x6x6xf32>
    %19 = arith.mulf %16, %18 : vector<1x6x6xf32>
    %cst_13 = arith.constant dense<0.000000e+00> : vector<1x6xf32>
    %20 = vector.multi_reduction <add>, %19, %cst_13 [2] : vector<1x6x6xf32> to vector<1x6xf32>
    %21 = vector.shape_cast %15 : vector<6x6xf32> to vector<1x6x6xf32>
    %22 = vector.shape_cast %3 : vector<1x6xf32> to vector<1x1x6xf32>
    %23 = vector.broadcast %22 : vector<1x1x6xf32> to vector<1x6x6xf32>
    %24 = arith.mulf %21, %23 : vector<1x6x6xf32>
    %cst_14 = arith.constant dense<0.000000e+00> : vector<1x6xf32>
    %25 = vector.multi_reduction <add>, %24, %cst_14 [2] : vector<1x6x6xf32> to vector<1x6xf32>
    %26 = vector.extract_strided_slice %20 {offsets = [0, 5], sizes = [1, 1], strides = [1, 1]} : vector<1x6xf32> to vector<1x1xf32>
    %27 = vector.extract_strided_slice %20 {offsets = [0, 0], sizes = [1, 1], strides = [1, 1]} : vector<1x6xf32> to vector<1x1xf32>
    %28 = arith.subf %26, %27 : vector<1x1xf32>
    %29 = vector.extract_strided_slice %25 {offsets = [0, 5], sizes = [1, 1], strides = [1, 1]} : vector<1x6xf32> to vector<1x1xf32>
    %30 = vector.extract_strided_slice %25 {offsets = [0, 0], sizes = [1, 1], strides = [1, 1]} : vector<1x6xf32> to vector<1x1xf32>
    %31 = arith.subf %29, %30 : vector<1x1xf32>
    %32 = arith.mulf %28, %28 : vector<1x1xf32>
    %33 = arith.mulf %31, %31 : vector<1x1xf32>
    %34 = arith.addf %32, %33 : vector<1x1xf32>
    %cst_15 = arith.constant 1.000000e+00 : f32
    %35 = vector.broadcast %cst_15 : f32 to vector<1x1xf32>
    %36 = arith.cmpf olt, %34, %35 : vector<1x1xf32>
    %37 = vector.shape_cast %20 : vector<1x6xf32> to vector<1x6x1xf32>
    %38 = vector.shape_cast %5 : vector<1x320xf32> to vector<1x1x320xf32>
    %39 = vector.broadcast %37 : vector<1x6x1xf32> to vector<1x6x320xf32>
    %40 = vector.broadcast %38 : vector<1x1x320xf32> to vector<1x6x320xf32>
    %41 = arith.subf %39, %40 : vector<1x6x320xf32>
    %42 = vector.shape_cast %25 : vector<1x6xf32> to vector<1x6x1xf32>
    %43 = vector.shape_cast %7 : vector<1x320xf32> to vector<1x1x320xf32>
    %44 = vector.broadcast %42 : vector<1x6x1xf32> to vector<1x6x320xf32>
    %45 = vector.broadcast %43 : vector<1x1x320xf32> to vector<1x6x320xf32>
    %46 = arith.subf %44, %45 : vector<1x6x320xf32>
    %47 = arith.mulf %41, %41 : vector<1x6x320xf32>
    %48 = arith.mulf %46, %46 : vector<1x6x320xf32>
    %49 = arith.addf %47, %48 : vector<1x6x320xf32>
    %cst_16 = arith.constant dense<0x7F800000> : vector<1x6xf32>
    %50 = vector.multi_reduction <minimumf>, %49, %cst_16 [2] : vector<1x6x320xf32> to vector<1x6xf32>
    %51 = vector.shape_cast %50 : vector<1x6xf32> to vector<1x6x1xf32>
    %52 = tpu.iota {dimensions = array<i32: 2>} : vector<1x6x320xi32>
    %53 = vector.broadcast %51 : vector<1x6x1xf32> to vector<1x6x320xf32>
    %54 = arith.cmpf oeq, %49, %53 : vector<1x6x320xf32>
    %c320_i32 = arith.constant 320 : i32
    %55 = vector.broadcast %c320_i32 : i32 to vector<1x6x320xi32>
    %56 = arith.select %54, %52, %55 : vector<1x6x320xi1>, vector<1x6x320xi32>
    %cst_17 = arith.constant dense<2147483647> : vector<1x6xi32>
    %57 = vector.multi_reduction <minsi>, %56, %cst_17 [2] : vector<1x6x320xi32> to vector<1x6xi32>
    %58 = vector.shape_cast %57 : vector<1x6xi32> to vector<1x6x1xi32>
    %59 = vector.broadcast %58 : vector<1x6x1xi32> to vector<1x6x320xi32>
    %60 = arith.cmpi eq, %52, %59 : vector<1x6x320xi32>
    %cst_18 = arith.constant 1.000000e+00 : f32
    %cst_19 = arith.constant 0.000000e+00 : f32
    %61 = vector.broadcast %cst_18 : f32 to vector<1x6x320xf32>
    %62 = vector.broadcast %cst_19 : f32 to vector<1x6x320xf32>
    %63 = arith.select %60, %61, %62 : vector<1x6x320xi1>, vector<1x6x320xf32>
    %64 = vector.shape_cast %5 : vector<1x320xf32> to vector<1x1x320xf32>
    %65 = vector.broadcast %64 : vector<1x1x320xf32> to vector<1x6x320xf32>
    %66 = arith.mulf %63, %65 : vector<1x6x320xf32>
    %cst_20 = arith.constant dense<0.000000e+00> : vector<1x6xf32>
    %67 = vector.multi_reduction <add>, %66, %cst_20 [2] : vector<1x6x320xf32> to vector<1x6xf32>
    %68 = vector.shape_cast %7 : vector<1x320xf32> to vector<1x1x320xf32>
    %69 = vector.broadcast %68 : vector<1x1x320xf32> to vector<1x6x320xf32>
    %70 = arith.mulf %63, %69 : vector<1x6x320xf32>
    %cst_21 = arith.constant dense<0.000000e+00> : vector<1x6xf32>
    %71 = vector.multi_reduction <add>, %70, %cst_21 [2] : vector<1x6x320xf32> to vector<1x6xf32>
    %72 = vector.shape_cast %9 : vector<1x320xf32> to vector<1x1x320xf32>
    %73 = vector.broadcast %72 : vector<1x1x320xf32> to vector<1x6x320xf32>
    %74 = arith.mulf %63, %73 : vector<1x6x320xf32>
    %cst_22 = arith.constant dense<0.000000e+00> : vector<1x6xf32>
    %75 = vector.multi_reduction <add>, %74, %cst_22 [2] : vector<1x6x320xf32> to vector<1x6xf32>
    %cst_23 = arith.constant 5.000000e-01 : f32
    %76 = vector.broadcast %cst_23 : f32 to vector<1x6xf32>
    %77 = arith.cmpf ogt, %75, %76 : vector<1x6xf32>
    %c1_i32 = arith.constant 1 : i32
    %78 = vector.broadcast %c1_i32 : i32 to vector<1x6xi32>
    %79 = arith.subi %57, %78 : vector<1x6xi32>
    %c1_i32_24 = arith.constant 1 : i32
    %80 = vector.broadcast %c1_i32_24 : i32 to vector<1x6xi32>
    %81 = arith.addi %57, %80 : vector<1x6xi32>
    %82 = arith.select %77, %79, %81 : vector<1x6xi1>, vector<1x6xi32>
    %83 = vector.shape_cast %82 : vector<1x6xi32> to vector<1x6x1xi32>
    %84 = vector.broadcast %83 : vector<1x6x1xi32> to vector<1x6x320xi32>
    %85 = arith.cmpi eq, %52, %84 : vector<1x6x320xi32>
    %cst_25 = arith.constant 1.000000e+00 : f32
    %cst_26 = arith.constant 0.000000e+00 : f32
    %86 = vector.broadcast %cst_25 : f32 to vector<1x6x320xf32>
    %87 = vector.broadcast %cst_26 : f32 to vector<1x6x320xf32>
    %88 = arith.select %85, %86, %87 : vector<1x6x320xi1>, vector<1x6x320xf32>
    %89 = vector.shape_cast %5 : vector<1x320xf32> to vector<1x1x320xf32>
    %90 = vector.broadcast %89 : vector<1x1x320xf32> to vector<1x6x320xf32>
    %91 = arith.mulf %88, %90 : vector<1x6x320xf32>
    %cst_27 = arith.constant dense<0.000000e+00> : vector<1x6xf32>
    %92 = vector.multi_reduction <add>, %91, %cst_27 [2] : vector<1x6x320xf32> to vector<1x6xf32>
    %93 = vector.shape_cast %7 : vector<1x320xf32> to vector<1x1x320xf32>
    %94 = vector.broadcast %93 : vector<1x1x320xf32> to vector<1x6x320xf32>
    %95 = arith.mulf %88, %94 : vector<1x6x320xf32>
    %cst_28 = arith.constant dense<0.000000e+00> : vector<1x6xf32>
    %96 = vector.multi_reduction <add>, %95, %cst_28 [2] : vector<1x6x320xf32> to vector<1x6xf32>
    %97 = arith.subf %67, %20 : vector<1x6xf32>
    %98 = arith.subf %71, %25 : vector<1x6xf32>
    %99 = arith.mulf %97, %97 : vector<1x6xf32>
    %100 = arith.mulf %98, %98 : vector<1x6xf32>
    %101 = arith.addf %99, %100 : vector<1x6xf32>
    %cst_29 = arith.constant 4.000000e+00 : f32
    %102 = vector.broadcast %cst_29 : f32 to vector<1x6xf32>
    %103 = arith.cmpf ogt, %101, %102 : vector<1x6xf32>
    %c1_i32_30 = arith.constant 1 : i32
    %104 = vector.broadcast %c1_i32_30 : i32 to vector<6x6xi32>
    %105 = arith.addi %10, %104 : vector<6x6xi32>
    %c5_i32 = arith.constant 5 : i32
    %106 = vector.broadcast %c5_i32 : i32 to vector<6x6xi32>
    %107 = arith.minsi %105, %106 : vector<6x6xi32>
    %108 = arith.cmpi eq, %11, %107 : vector<6x6xi32>
    %cst_31 = arith.constant 1.000000e+00 : f32
    %cst_32 = arith.constant 0.000000e+00 : f32
    %109 = vector.broadcast %cst_31 : f32 to vector<6x6xf32>
    %110 = vector.broadcast %cst_32 : f32 to vector<6x6xf32>
    %111 = arith.select %108, %109, %110 : vector<6x6xi1>, vector<6x6xf32>
    %112 = vector.shape_cast %111 : vector<6x6xf32> to vector<1x6x6xf32>
    %113 = vector.shape_cast %1 : vector<1x6xf32> to vector<1x1x6xf32>
    %114 = vector.broadcast %113 : vector<1x1x6xf32> to vector<1x6x6xf32>
    %115 = arith.mulf %112, %114 : vector<1x6x6xf32>
    %cst_33 = arith.constant dense<0.000000e+00> : vector<1x6xf32>
    %116 = vector.multi_reduction <add>, %115, %cst_33 [2] : vector<1x6x6xf32> to vector<1x6xf32>
    %117 = vector.shape_cast %111 : vector<6x6xf32> to vector<1x6x6xf32>
    %118 = vector.shape_cast %3 : vector<1x6xf32> to vector<1x1x6xf32>
    %119 = vector.broadcast %118 : vector<1x1x6xf32> to vector<1x6x6xf32>
    %120 = arith.mulf %117, %119 : vector<1x6x6xf32>
    %cst_34 = arith.constant dense<0.000000e+00> : vector<1x6xf32>
    %121 = vector.multi_reduction <add>, %120, %cst_34 [2] : vector<1x6x6xf32> to vector<1x6xf32>
    %122 = arith.subf %92, %67 : vector<1x6xf32>
    %123 = arith.subf %96, %71 : vector<1x6xf32>
    %124 = vector.broadcast %36 : vector<1x1xi1> to vector<1x6xi1>
    %125 = arith.ori %103, %124 : vector<1x6xi1>
    %cst_35 = arith.constant 1.000000e+00 : f32
    %cst_36 = arith.constant 0.000000e+00 : f32
    %126 = vector.broadcast %cst_35 : f32 to vector<1x6xf32>
    %127 = vector.broadcast %cst_36 : f32 to vector<1x6xf32>
    %128 = arith.select %125, %126, %127 : vector<1x6xi1>, vector<1x6xf32>
    %c0_37 = arith.constant 0 : index
    %c0_38 = arith.constant 0 : index
    %c0_39 = arith.constant 0 : index
    %129 = vector.load %arg3[%c0_37, %c0_38, %c0_39] : memref<1x5x6xf32, #tpu.memory_space<vmem>>, vector<1x1x6xf32>
    %130 = vector.shape_cast %129 : vector<1x1x6xf32> to vector<1x6xf32>
    %131 = vector.shape_cast %116 : vector<1x6xf32> to vector<1x1x6xf32>
    tpu.vector_store %arg3[%c0_37, %c0_38, %c0_39], %131 {strides = array<i32>} : memref<1x5x6xf32, #tpu.memory_space<vmem>>, vector<1x1x6xf32>,
    %c0_40 = arith.constant 0 : index
    %c1_41 = arith.constant 1 : index
    %c0_42 = arith.constant 0 : index
    %132 = vector.load %arg3[%c0_40, %c1_41, %c0_42] : memref<1x5x6xf32, #tpu.memory_space<vmem>>, vector<1x1x6xf32>
    %133 = vector.shape_cast %132 : vector<1x1x6xf32> to vector<1x6xf32>
    %134 = vector.shape_cast %121 : vector<1x6xf32> to vector<1x1x6xf32>
    tpu.vector_store %arg3[%c0_40, %c1_41, %c0_42], %134 {strides = array<i32>} : memref<1x5x6xf32, #tpu.memory_space<vmem>>, vector<1x1x6xf32>,
    %c0_43 = arith.constant 0 : index
    %c2_44 = arith.constant 2 : index
    %c0_45 = arith.constant 0 : index
    %135 = vector.load %arg3[%c0_43, %c2_44, %c0_45] : memref<1x5x6xf32, #tpu.memory_space<vmem>>, vector<1x1x6xf32>
    %136 = vector.shape_cast %135 : vector<1x1x6xf32> to vector<1x6xf32>
    %137 = vector.shape_cast %122 : vector<1x6xf32> to vector<1x1x6xf32>
    tpu.vector_store %arg3[%c0_43, %c2_44, %c0_45], %137 {strides = array<i32>} : memref<1x5x6xf32, #tpu.memory_space<vmem>>, vector<1x1x6xf32>,
    %c0_46 = arith.constant 0 : index
    %c3 = arith.constant 3 : index
    %c0_47 = arith.constant 0 : index
    %138 = vector.load %arg3[%c0_46, %c3, %c0_47] : memref<1x5x6xf32, #tpu.memory_space<vmem>>, vector<1x1x6xf32>
    %139 = vector.shape_cast %138 : vector<1x1x6xf32> to vector<1x6xf32>
    %140 = vector.shape_cast %123 : vector<1x6xf32> to vector<1x1x6xf32>
    tpu.vector_store %arg3[%c0_46, %c3, %c0_47], %140 {strides = array<i32>} : memref<1x5x6xf32, #tpu.memory_space<vmem>>, vector<1x1x6xf32>,
    %c0_48 = arith.constant 0 : index
    %c4 = arith.constant 4 : index
    %c0_49 = arith.constant 0 : index
    %141 = vector.load %arg3[%c0_48, %c4, %c0_49] : memref<1x5x6xf32, #tpu.memory_space<vmem>>, vector<1x1x6xf32>
    %142 = vector.shape_cast %141 : vector<1x1x6xf32> to vector<1x6xf32>
    %143 = vector.shape_cast %128 : vector<1x6xf32> to vector<1x1x6xf32>
    tpu.vector_store %arg3[%c0_48, %c4, %c0_49], %143 {strides = array<i32>} : memref<1x5x6xf32, #tpu.memory_space<vmem>>, vector<1x1x6xf32>,
    return
  }
  func.func @transform_0(%arg0: i32) -> (i32, i32, i32) {
    %c0_i32 = arith.constant 0 : i32
    %c0_i32_0 = arith.constant 0 : i32
    %c0_i32_1 = arith.constant 0 : i32
    return %arg0, %c0_i32, %c0_i32_0 : i32, i32, i32
  }
  func.func @transform_1(%arg0: i32) -> (i32, i32, i32) {
    %c0_i32 = arith.constant 0 : i32
    %c0_i32_0 = arith.constant 0 : i32
    %c0_i32_1 = arith.constant 0 : i32
    return %arg0, %c0_i32, %c0_i32_0 : i32, i32, i32
  }
  func.func @transform_2(%arg0: i32) -> (i32, i32, i32) {
    %c0_i32 = arith.constant 0 : i32
    %c0_i32_0 = arith.constant 0 : i32
    %c0_i32_1 = arith.constant 0 : i32
    return %arg0, %c0_i32, %c0_i32_0 : i32, i32, i32
  }
}

</mosaic_0001>

<bundles_post_ra>
// kernel: plan_map_direction_loss.1
= control target key start
LH: loop header
LB: loop body
LE: loop exit
PB: predicated region body
PF: predicated region fallthrough
CT: control target
= control target key end

     0   :  { %s559_s9 = smov 0   ;;  %s730_s0 = inlined_call_operand.vmem [shape: f32[2,2,6], index: 0, kind: input, shape index: {}]   ;;  %s731_s1 = inlined_call_operand.vmem [shape: f32[2,3,320], index: 1, kind: input, shape index: {}]   ;;  %s732_s2 = inlined_call_operand.vmem [shape: f32[2,5,6], index: 2, kind: output, shape index: {}]  }
   0x1 LB: > { %s506_s10 = sadd.s32 4294967295, %s540_s9   ;;  %p510_p0 = scmp.ge.s32.totalorder %s540_s9, 1  ;;  %s540_s9 = sphi %s559_s9, %s12_s9  }
   0x2   : > { %p121_p1 = scmp.lt.s32.totalorder %s540_s9, 3 }
   0x4   : > { %p122_p2 = pnand %p510_p0, %p121_p1 }
   0x5   : > { %p146_p3 = scmp.lt.s32.totalorder (!%p122_p2), %s506_s10, 1 }
   0x6   : > { %125 = sbr.rel (%p122_p2) target bundleno = 911 (0x38f), region = 28 }
   0xb   : > { %v166_v0 = vlaneseq  ;;  %s734_s10 = smov (!%p146_p3, %s506_s10), 1  ;;  %v542_v3 = vmov 0.0   ;;  %vm177_vm1 = vcmask 46080   ;;  %v543_v11 = vmov 0  }
   0xc   : > { %s511_s11 = sshll.u32 %s734_s10, 1  ;;  %532 = vset.pattern.permute.xlu0 %v543_v11  ;;  %533 = vset.pattern.permute.xlu1 %v543_v11  ;;  %s521_s15 = smul.u32 12, %s734_s10  ;;  %vm248_vm2 = vcmask 1045504   ;;  %vm251_vm3 = vcmask 521216  }
   0xd   : > { %v569_v1 = vshrl.u32 %v166_v0, 7  ;;  %v571_v2 = vand.u32 127, %v166_v0  ;;  %s149_s14 = scalar_lea.vmem %s730_s0, %s511_s11  ;;  %s513_s19 = sshll.u32 %s734_s10, 3 }
   0xe   : > { %v580_v5 = vld [vmem:[%s149_s14] ss:$0 sm:$0xff]  ;;  %v582_v6 = vld [vmem:[%s149_s14 + $0x1] ss:$0 sm:$0xff]  ;;  %s594_s18 = scalar_lea.vmem %s731_s1, %s521_s15  ;;  %s158_s22 = scalar_lea.vmem %s732_s2, %s513_s19 }
   0xf   : > { %vm170_vm0 = vcmp.le.s32.totalorder %v571_v2, %v569_v1  ;;  %v597_v12 = vsub.s32 0, %v569_v1  ;;  %v600_v13 = vsub.s32 1, %v569_v1  ;;  %v161_v14 = vld [vmem:[%s594_s18] ss:$4 sm:$0x7]  ;;  %v604_v15 = vsub.s32 2, %v569_v1 }
  0x10   : > { %v171_v4 = vsel %vm170_vm0, 1.0, %v542_v3  ;;  %v514_v16 = vld [vmem:[%s594_s18 + $0x1] ss:$4 sm:$0x7]  ;;  %v645_v45 = vadd.s32 128, %v571_v2  ;;  %v648_v46 = vadd.s32 256, %v571_v2 }
  0x11   : > { %v176_v7 = vmul.f32 %v580_v5, %v171_v4  ;;  %v185_v8 = vmul.f32 %v582_v6, %v171_v4  ;;  %v608_v17 = vrot.slane %v161_v14, %v597_v12  ;;  %v611_v18 = vrot.slane %v161_v14, %v600_v13  ;;  %v515_v0 = vld [vmem:[%s594_s18 + $0x2] ss:$4 sm:$0x7] }
  0x12   : > { %v614_v19 = vrot.slane %v161_v14, %v604_v15  ;;  %v619_v21 = vrot.slane %v514_v16, %v597_v12  ;;  %v622_v22 = vrot.slane %v514_v16, %v600_v13  ;;  %v625_v23 = vrot.slane %v514_v16, %v604_v15 }
  0x13   : > { %v178_v9 = vsel %vm177_vm1, %v176_v7, 0.0  ;;  %v186_v10 = vsel %vm177_vm1, %v185_v8, 0.0  ;;  %v324_v14 = vrot.slane %v515_v0, %v604_v15 }
  0x14   : > { %179 = vadd.xlane.f32.xlu0 %v178_v9  ;;  %v316_v9 = vrot.slane %v515_v0, %v597_v12 }
  0x18   : > { %187 = vadd.xlane.f32.xlu0 %v186_v10  ;;  %v320_v10 = vrot.slane %v515_v0, %v600_v13 }
  0x9d   : > { %v616_v20 = vpop.xlane.xlu0 %179 }
  0x9e   : > { %v217_v24 = vsub.f32 %v616_v20, %v608_v17  ;;  %v218_v25 = vsub.f32 %v616_v20, %v611_v18  ;;  %v219_v26 = vsub.f32 %v616_v20, %v614_v19 }
  0xa0   : > { %v239_v31 = vmul.f32 %v217_v24, %v217_v24  ;;  %v240_v32 = vmul.f32 %v218_v25, %v218_v25  ;;  %v241_v33 = vmul.f32 %v219_v26, %v219_v26 }
  0xa1   : > { %v633_v27 = vpop.xlane.xlu0 %187 }
  0xa2   : > { %v236_v28 = vsub.f32 %v633_v27, %v619_v21  ;;  %v237_v29 = vsub.f32 %v633_v27, %v622_v22  ;;  %v238_v30 = vsub.f32 %v633_v27, %v625_v23 }
  0xa4   : > { %v242_v34 = vmul.f32 %v236_v28, %v236_v28  ;;  %v243_v35 = vmul.f32 %v237_v29, %v237_v29  ;;  %v244_v36 = vmul.f32 %v238_v30, %v238_v30 }
  0xa6   : > { %v245_v37 = vadd.f32 %v242_v34, %v239_v31  ;;  %v246_v38 = vadd.f32 %v243_v35, %v240_v32  ;;  %v247_v39 = vadd.f32 %v244_v36, %v241_v33 }
  0xa8   : > { %v249_v40 = vsel %vm248_vm2, %v245_v37, inf  ;;  %v250_v41 = vsel %vm248_vm2, %v246_v38, inf  ;;  %v252_v43 = vsel %vm251_vm3, %v247_v39, inf }
  0xa9   : > { %v253_v42 = vmin.f32 %v249_v40, %v250_v41 }
  0xab   : > { %v254_v44 = vmin.f32 %v253_v42, %v252_v43 }
  0xad   : > { %255 = vmin.xlane.f32.xlu1 %v254_v44 }
 0x136   : > { %v256_v47 = vpop.xlane.xlu1 %255 }
 0x137   : > { %vm259_vm4 = vcmp.eq.f32.partialorder %v245_v37, %v256_v47  ;;  %vm260_vm5 = vcmp.eq.f32.partialorder %v246_v38, %v256_v47  ;;  %vm261_vm6 = vcmp.eq.f32.partialorder %v247_v39, %v256_v47 }
 0x138   : > { %v262_v48 = vsel %vm259_vm4, %v571_v2, 320  ;;  %v263_v49 = vsel %vm260_vm5, %v645_v45, 320  ;;  %v264_v50 = vsel %vm261_vm6, %v648_v46, 320 }
 0x139   : > { %v265_v51 = vsel %vm248_vm2, %v262_v48, 2147483647  ;;  %v266_v52 = vsel %vm248_vm2, %v263_v49, 2147483647  ;;  %v267_v53 = vsel %vm251_vm3, %v264_v50, 2147483647 }
 0x13a   : > { %vm268_vm7 = vcmp.lt.s32.totalorder %v265_v51, %v266_v52  ;;  %v194_v50 = vrot.slane %v633_v27, 3 }
 0x13b   : > { %v269_v54 = vsel %vm268_vm7, %v265_v51, %v266_v52  ;;  %v190_v51 = vrot.slane %v616_v20, 3 }
 0x13c   : > { %vm270_vm8 = vcmp.lt.s32.totalorder %v269_v54, %v267_v53  ;;  %v196_v52 = vsub.f32 %v633_v27, %v194_v50 }
 0x13d   : > { %v271_v55 = vsel %vm270_vm8, %v269_v54, %v267_v53  ;;  %v374_v53 = vadd.s32 1, %v569_v1  ;;  %v192_v54 = vsub.f32 %v616_v20, %v190_v51 }
 0x13e   : > { %v273_v56 = vshra.s32 %v271_v55, 16  ;;  %v272_v58 = vand.u32 65535, %v271_v55 }
 0x13f   : > { %vm375_vm13 = vcmp.lt.s32.totalorder %v374_v53, 5 }
 0x140   : > { %v275_v57 = vcvt.s32.f32 %v273_v56  ;;  %v274_v60 = vcvt.s32.f32 %v272_v58  ;;  %v376_v55 = vsel %vm375_vm13, %v374_v53, 5  ;;  %v198_v56 = vmul.f32 %v196_v52, %v196_v52 }
 0x141   : > { %vm377_vm14 = vcmp.eq.s32.totalorder %v571_v2, %v376_v55  ;;  %v197_v58 = vmul.f32 %v192_v54, %v192_v54 }
 0x142   : > { %276 = vmin.xlane.f32.xlu1 %v275_v57 }
 0x1cb   : > { %v277_v59 = vpop.xlane.xlu1 %276 }
 0x1cc   : > { %vm278_vm9 = vcmp.eq.f32.partialorder %v275_v57, %v277_v59  ;;  %v283_v62 = vcvt.f32.s32 %v277_v59  ;;  %v378_v57 = vsel %vm377_vm14, 1.0, %v542_v3 }
 0x1cd   : > { %v279_v61 = vsel %vm278_vm9, %v274_v60, inf  ;;  %v379_v59 = vmul.f32 %v580_v5, %v378_v57  ;;  %v199_v60 = vadd.f32 %v198_v56, %v197_v58 }
 0x1ce   : > { %280 = vmin.xlane.f32.xlu0 %v279_v61  ;;  %v284_v4 = vshll.u32 %v283_v62, 16  ;;  %v383_v62 = vmul.f32 %v582_v6, %v378_v57 }
 0x1cf   : > { %v380_v61 = vsel %vm177_vm1, %v379_v59, 0.0  ;;  %vm200_vm15 = vcmp.lt.f32.partialorder %v199_v60, 1.0 }
 0x1d0   : > { %v389_v0 = vsel %vm200_vm15, 1, %v543_v11 }
 0x257   : > { %v281_v63 = vpop.xlane.xlu0 %280 }
 0x258   : > { %v282_v7 = vcvt.f32.s32 %v281_v63  ;;  %v384_v63 = vsel %vm177_vm1, %v383_v62, 0.0 }
 0x25a   : > { %v285_v8 = vadd.s32 %v284_v4, %v282_v7 }
 0x25c   : > { %vm286_vm10 = vcmp.eq.s32.totalorder %v571_v2, %v285_v8  ;;  %vm287_vm11 = vcmp.eq.s32.totalorder %v645_v45, %v285_v8  ;;  %vm288_vm12 = vcmp.eq.s32.totalorder %v648_v46, %v285_v8  ;;  %v518_v4 = vadd.s32 4294967295, %v285_v8 }
 0x25d   : > { %v289_v16 = vsel %vm286_vm10, 1.0, %v542_v3  ;;  %v290_v24 = vsel %vm287_vm11, 1.0, %v542_v3  ;;  %v291_v25 = vsel %vm288_vm12, 1.0, %v542_v3  ;;  %v340_v7 = vadd.s32 1, %v285_v8 }
 0x25e   : > { %v328_v26 = vmul.f32 %v316_v9, %v289_v16  ;;  %v329_v28 = vmul.f32 %v320_v10, %v290_v24  ;;  %v330_v29 = vmul.f32 %v324_v14, %v291_v25  ;;  %v292_v12 = vmul.f32 %v289_v16, %v608_v17 }
 0x25f   : > { %v293_v13 = vmul.f32 %v290_v24, %v611_v18  ;;  %v294_v15 = vmul.f32 %v291_v25, %v614_v19  ;;  %v302_v30 = vmul.f32 %v289_v16, %v619_v21  ;;  %v303_v31 = vmul.f32 %v290_v24, %v622_v22 }
 0x260   : > { %v331_v32 = vsel %vm248_vm2, %v328_v26, 0.0  ;;  %v332_v33 = vsel %vm248_vm2, %v329_v28, 0.0  ;;  %v295_v34 = vsel %vm248_vm2, %v292_v12, 0.0  ;;  %v334_v36 = vsel %vm251_vm3, %v330_v29, 0.0 }
 0x261   : > { %v333_v35 = vadd.f32 %v332_v33, %v331_v32  ;;  %v296_v37 = vsel %vm248_vm2, %v293_v13, 0.0  ;;  %v304_v39 = vmul.f32 %v291_v25, %v625_v23  ;;  %v305_v40 = vsel %vm248_vm2, %v302_v30, 0.0 }
 0x262   : > { %v297_v38 = vadd.f32 %v296_v37, %v295_v34  ;;  %v306_v41 = vsel %vm248_vm2, %v303_v31, 0.0  ;;  %v298_v43 = vsel %vm251_vm3, %v294_v15, 0.0  ;;  %v405_v31 = vsub.s32 %v571_v2, %v569_v1 }
 0x263   : > { %v335_v42 = vadd.f32 %v334_v36, %v333_v35  ;;  %v307_v44 = vadd.f32 %v306_v41, %v305_v40  ;;  %v308_v48 = vsel %vm251_vm3, %v304_v39, 0.0  ;;  %v397_v36 = vsub.s32 5, %v569_v1 }
 0x264   : > { %v299_v47 = vadd.f32 %v298_v43, %v297_v38 }
 0x265   : > { %336 = vadd.xlane.f32.xlu1 %v335_v42  ;;  %v309_v49 = vadd.f32 %v308_v48, %v307_v44 }
 0x266   : > { %300 = vadd.xlane.f32.xlu0 %v299_v47 }
 0x269   : > { %310 = vadd.xlane.f32.xlu1 %v309_v49 }
 0x26d   : > { %381 = vadd.xlane.f32.xlu1 %v380_v61 }
 0x271   : > { %385 = vadd.xlane.f32.xlu1 %v384_v63 }
 0x27c   : > { %391 = vperm.xlu0 %532, %v389_v0  }
 0x2ee   : > { %v337_v9 = vpop.xlane.xlu1 %336 }
 0x2ef   : > { %vm338_vm0 = vcmp.gt.f32.partialorder %v337_v9, 0.5  ;;  %v301_v13 = vpop.xlane.xlu0 %300 }
 0x2f0   : > { %v341_v10 = vsel %vm338_vm0, %v518_v4, %v340_v7  ;;  %v368_v35 = vsub.f32 %v301_v13, %v616_v20 }
 0x2f1   : > { %vm342_vm4 = vcmp.eq.s32.totalorder %v571_v2, %v341_v10  ;;  %vm343_vm5 = vcmp.eq.s32.totalorder %v645_v45, %v341_v10  ;;  %vm344_vm6 = vcmp.eq.s32.totalorder %v648_v46, %v341_v10 }
 0x2f2   : > { %v345_v5 = vsel %vm342_vm4, 1.0, %v542_v3  ;;  %v346_v6 = vsel %vm343_vm5, 1.0, %v542_v3  ;;  %v347_v14 = vsel %vm344_vm6, 1.0, %v542_v3  ;;  %v370_v39 = vmul.f32 %v368_v35, %v368_v35 }
 0x2f3   : > { %v348_v16 = vmul.f32 %v345_v5, %v608_v17  ;;  %v349_v24 = vmul.f32 %v346_v6, %v611_v18  ;;  %v350_v8 = vmul.f32 %v347_v14, %v614_v19  ;;  %v358_v25 = vmul.f32 %v345_v5, %v619_v21  ;;  %v311_v21 = vpop.xlane.xlu1 %310 }
 0x2f4   : > { %v359_v26 = vmul.f32 %v346_v6, %v622_v22  ;;  %v360_v18 = vmul.f32 %v347_v14, %v625_v23  ;;  %v369_v33 = vsub.f32 %v311_v21, %v633_v27 }
 0x2f5   : > { %v351_v45 = vsel %vm248_vm2, %v348_v16, 0.0  ;;  %v352_v46 = vsel %vm248_vm2, %v349_v24, 0.0  ;;  %v361_v29 = vsel %vm248_vm2, %v358_v25, 0.0  ;;  %v354_v17 = vsel %vm251_vm3, %v350_v8, 0.0 }
 0x2f6   : > { %v353_v28 = vadd.f32 %v352_v46, %v351_v45  ;;  %v362_v12 = vsel %vm248_vm2, %v359_v26, 0.0  ;;  %v364_v22 = vsel %vm251_vm3, %v360_v18, 0.0  ;;  %vm408_vm2 = vcmask 40960  }
 0x2f7   : > { %v363_v15 = vadd.f32 %v362_v12, %v361_v29  ;;  %v392_v30 = vpop.permute.xlu0 %391  ;;  %v382_v23 = vpop.xlane.xlu1 %381  ;;  %v371_v2 = vmul.f32 %v369_v33, %v369_v33 }
 0x2f8   : > { %v355_v19 = vadd.f32 %v354_v17, %v353_v28  ;;  %vm393_vm1 = vcmp.eq.s32.totalorder %v392_v30, 1  ;;  %v406_v34 = vrot.slane %v382_v23, %v405_v31 }
 0x2f9   : > { %v365_v32 = vadd.f32 %v364_v22, %v363_v15  ;;  %v394_v37 = vsel %vm393_vm1, 1, %v543_v11  ;;  %v372_v41 = vadd.f32 %v371_v2, %v370_v39 }
 0x2fa   : > { %356 = vadd.xlane.f32.xlu1 %v355_v19  ;;  %409 = vst.msk [vmem:[%s158_s22] sm:$0x1] %vm408_vm2, %v406_v34  ;;  %v398_v40 = vrot.slane %v394_v37, %v397_v36 }
 0x2fb   : > { %v386_v38 = vpop.xlane.xlu1 %385  ;;  %vm373_vm7 = vcmp.gt.f32.partialorder %v372_v41, 4.0 }
 0x2fc   : > { %v414_v27 = vrot.slane %v386_v38, %v405_v31  ;;  %vm399_vm3 = vcmp.ne.s32.totalorder %v398_v40, 0 }
 0x2fd   : > { %vm400_vm8 = vmor %vm373_vm7, %vm399_vm3 }
 0x2fe   : > { %366 = vadd.xlane.f32.xlu1 %v365_v32  ;;  %416 = vst.msk [vmem:[%s158_s22 + $0x1] sm:$0x1] %vm408_vm2, %v414_v27  ;;  %v401_v42 = vsel %vm400_vm8, 1.0, %v542_v3 }
 0x30f   : > { %433 = vperm.xlu1 %533, %v401_v42  }
 0x383   : > { %v357_v20 = vpop.xlane.xlu1 %356 }
 0x384   : > { %v387_v1 = vsub.f32 %v357_v20, %v301_v13 }
 0x386   : > { %v421_v43 = vrot.slane %v387_v1, %v405_v31 }
 0x387   : > { %v367_v11 = vpop.xlane.xlu1 %366 }
 0x388   : > { %423 = vst.msk [vmem:[%s158_s22 + $0x2] sm:$0x1] %vm408_vm2, %v421_v43  ;;  %v388_v44 = vsub.f32 %v367_v11, %v311_v21 }
 0x38a   : > { %v428_v47 = vrot.slane %v388_v44, %v405_v31 }
 0x38b   : > { %v434_v48 = vpop.permute.xlu1 %433 }
 0x38c   : > { %430 = vst.msk [vmem:[%s158_s22 + $0x3] sm:$0x1] %vm408_vm2, %v428_v47  ;;  %v438_v49 = vrot.slane %v434_v48, %v405_v31 }
 0x38e   : > { %440 = vst.msk [vmem:[%s158_s22 + $0x4] sm:$0x1] %vm408_vm2, %v438_v49 }
 0x38f PF: > { %s12_s9 = sadd.s32 1, %s540_s9  }
 0x390   : > { %p9_p4 = scmp.ge.s32.totalorder %s12_s9, 4  }
 0x392   :  { %11 = sbr.rel (!%p9_p4) target bundleno = 1 (0x1), region = 63 }

</bundles_post_ra>
